<compile_context>
chip_gen: v5e
topology: v5e:2x2
jax: 0.10.0
libtpu: 0.0.40
codegen_flags: <defaults>
</compile_context>

<pallas_src>
import jax
import jax.numpy as jnp
import numpy as np
from jax import lax
from jax.experimental import pallas as pl
from jax.experimental.pallas import tpu as pltpu

B = 4            # number of graphs in the batch
N = 16           # nodes per graph
IN_DIM = 32      # input feature dim
OUT_DIM = 32     # per-head output dim
HEADS = 2        # num_heads
HD = HEADS * OUT_DIM
NEG_SLOPE = 0.2  # GATConv LeakyReLU slope
LN_EPS = 1e-5    # LayerNorm eps
NEG_BIG = 1e30   # additive-mask magnitude (assumes binary adjacency + self-loops)


def _make_kernel(gn):
    """Kernel over one stacked group of graphs (gn = graphs_per_group * N)."""

    def kernel(feat_ref, mask_ref, wbig_ref, consts_ref, out_ref):
        feat = feat_ref[...]                                        # (gn, IN_DIM)
        consts = consts_ref[...]                                    # (3+HEADS, HD)

        # One MXU push gives node features AND both heads' attention scores.
        hs = jnp.dot(feat, wbig_ref[...],
                     preferred_element_type=jnp.float32)            # (gn, HD+2*HEADS)
        h = hs[:, :HD]                                              # (gn, HD)
        el = hs[:, HD:HD + HEADS]                                   # (gn, HEADS) src scores
        er = hs[:, HD + HEADS:HD + 2 * HEADS]                       # (gn, HEADS) dst scores

        # Stack both heads along sublanes: e[hd*gn + dst, src].
        el_hn = el.T                                                # (HEADS, gn) tiny transpose
        e_src = jnp.concatenate(
            [jnp.broadcast_to(el_hn[hd:hd + 1, :], (gn, gn)) for hd in range(HEADS)],
            axis=0)                                                 # (HEADS*gn, gn)
        e_dst = jnp.concatenate(
            [er[:, hd:hd + 1] for hd in range(HEADS)], axis=0)      # (HEADS*gn, 1)

        e = e_dst + e_src
        e = jnp.where(e > 0.0, e, NEG_SLOPE * e)                    # LeakyReLU
        e = e + mask_ref[...]                                       # -1e30 off-edge / cross-graph

        # One fused softmax over sources for all heads (self-loops guarantee
        # >= 1 valid entry per row, so the denominator is >= 1).
        m = jnp.max(e, axis=-1, keepdims=True)
        p = jnp.exp(e - m)                                          # masked entries -> 0
        s = jnp.sum(p, axis=-1, keepdims=True)
        alpha = p * pl.reciprocal(s, approx=True)                   # (HEADS*gn, gn)

        # Single aggregation matmul for all heads, then per-head column select.
        agg = jnp.dot(alpha, h, preferred_element_type=jnp.float32) # (HEADS*gn, HD)
        rst = jnp.zeros((gn, HD), jnp.float32)
        for hd in range(HEADS):
            hmask = consts[3 + hd:4 + hd, :]                        # (1, HD)
            rst = rst + agg[hd * gn:(hd + 1) * gn, :] * hmask

        rst = rst + consts[0:1, :]                                  # GATConv bias

        # LayerNorm over the flattened (HEADS*OUT_DIM) feature axis.
        mu = jnp.mean(rst, axis=-1, keepdims=True)
        var = jnp.mean((rst - mu) ** 2, axis=-1, keepdims=True)
        y = (rst - mu) * lax.rsqrt(var + LN_EPS)
        y = y * consts[1:2, :] + consts[2:3, :]

        # ELU (alpha = 1)
        y = jnp.where(y > 0.0, y, jnp.exp(y) - 1.0)

        # Mean over heads via lane slicing (no averaging-matrix input).
        acc = y[:, :OUT_DIM]
        for hd in range(1, HEADS):
            acc = acc + y[:, hd * OUT_DIM:(hd + 1) * OUT_DIM]
        out_ref[...] = acc * (1.0 / HEADS)

    return kernel


def _num_groups(batch):
    """grid=(2,) on v7x (2 TensorCores/chip), a single grid step elsewhere."""
    try:
        kind = jax.devices()[0].device_kind.lower()
    except Exception:
        kind = ""
    if "v7" in kind and batch % 2 == 0:
        return 2
    return 1


def _pack_weights(w, attn_l, attn_r, bias, gamma, beta):
    eye_h = jnp.eye(HEADS, dtype=jnp.float32)
    # Block-diagonal score projections: al_mat[g*D+d, h] = attn_l[g, d] * (g == h).
    al_mat = (attn_l[:, :, None] * eye_h[:, None, :]).reshape(HD, HEADS)
    ar_mat = (attn_r[:, :, None] * eye_h[:, None, :]).reshape(HD, HEADS)
    # Fold the score projections into the feature projection (one in-kernel matmul).
    w_big = jnp.concatenate([w, w @ al_mat, w @ ar_mat], axis=1)    # (IN_DIM, HD+2*HEADS)
    hmask = jnp.repeat(eye_h, OUT_DIM, axis=1)                      # (HEADS, HD)
    consts = jnp.concatenate([bias, gamma, beta, hmask], axis=0)    # (3+HEADS, HD)
    return w_big, consts


def _block_diag_mask(adj_group):
    """(gpb, N, N) binary adjacency -> (HEADS*gn, gn) additive softmax mask."""
    gpb = adj_group.shape[0]
    gn = gpb * N
    blocks = jnp.zeros((gn, gn), jnp.float32)
    for g in range(gpb):
        blocks = blocks.at[g * N:(g + 1) * N, g * N:(g + 1) * N].set(adj_group[g])
    addmask = (blocks - 1.0) * NEG_BIG        # 0 on edges, -1e30 elsewhere
    return jnp.tile(addmask, (HEADS, 1))


def graph_gat_conv(feat, adj, w, attn_l, attn_r, bias, gamma, beta, num_groups=None):
    batch = feat.shape[0]
    if num_groups is None:
        num_groups = _num_groups(batch)
    gpb = batch // num_groups
    gn = gpb * N

    w_big, consts = _pack_weights(w, attn_l, attn_r, bias, gamma, beta)
    feat_g = feat.reshape(num_groups, gn, IN_DIM)
    adj_g = adj.reshape(num_groups, gpb, N, N)
    mask_g = jnp.stack([_block_diag_mask(adj_g[i]) for i in range(num_groups)], axis=0)

    # Whole working set is < 150 KiB, far under VMEM on v5e/v6e/v7x: no extra
    # buffering / vmem_limit_bytes needed.
    out = pl.pallas_call(
        _make_kernel(gn),
        out_shape=jax.ShapeDtypeStruct((num_groups, gn, OUT_DIM), jnp.float32),
        grid=(num_groups,),
        in_specs=[
            pl.BlockSpec((None, gn, IN_DIM), lambda i: (i, 0, 0)),       # stacked feats
            pl.BlockSpec((None, HEADS * gn, gn), lambda i: (i, 0, 0)),   # additive mask
            pl.BlockSpec((IN_DIM, HD + 2 * HEADS), lambda i: (0, 0)),    # packed weights
            pl.BlockSpec((3 + HEADS, HD), lambda i: (0, 0)),             # packed constants
        ],
        out_specs=pl.BlockSpec((None, gn, OUT_DIM), lambda i: (i, 0, 0)),
        compiler_params=pltpu.CompilerParams(
            dimension_semantics=("parallel",)),
    )(feat_g, mask_g, w_big, consts)
    return out.reshape(batch, N, OUT_DIM)


def reference_single(feat, adj, w, attn_l, attn_r, bias, gamma, beta):
    """Pure-JAX reference of GraphGATConv forward (eval mode), one graph."""
    h = feat @ w                                       # (N, H*D)
    hh = h.reshape(N, HEADS, OUT_DIM)
    el = jnp.sum(hh * attn_l[None], axis=-1)           # (N, H) src scores
    er = jnp.sum(hh * attn_r[None], axis=-1)           # (N, H) dst scores
    e = er[:, None, :] + el[None, :, :]                # (dst, src, H)
    e = jnp.where(e > 0, e, NEG_SLOPE * e)
    mask = adj[:, :, None] > 0
    e = jnp.where(mask, e, -jnp.inf)
    alpha = jax.nn.softmax(e, axis=1)
    alpha = jnp.where(mask, alpha, 0.0)
    rst = jnp.einsum('dsh,shf->dhf', alpha, hh)        # (N, H, D)
    rst = rst.reshape(N, HD) + bias[0]
    mu = rst.mean(-1, keepdims=True)
    var = ((rst - mu) ** 2).mean(-1, keepdims=True)
    y = (rst - mu) / jnp.sqrt(var + LN_EPS) * gamma[0] + beta[0]
    y = jnp.where(y > 0, y, jnp.exp(y) - 1.0)
    return y.reshape(N, HEADS, OUT_DIM).mean(axis=1)


if __name__ == "__main__":
    key = jax.random.PRNGKey(0)
    k1, k2, k3, k4, k5, k6, k7, k8 = jax.random.split(key, 8)

    # batched inputs (B graphs)
    feat = jax.random.normal(k1, (B, N, IN_DIM), jnp.float32)
    adj = (jax.random.uniform(k2, (B, N, N)) < 0.3).astype(jnp.float32)
    adj = jnp.maximum(adj, jnp.eye(N, dtype=jnp.float32)[None])   # add self-loops

    # deterministic synthetic parameters (shapes per GATConv / LayerNorm init)
    w = 0.1 * jax.random.normal(k3, (IN_DIM, HD), jnp.float32)
    attn_l = 0.1 * jax.random.normal(k4, (HEADS, OUT_DIM), jnp.float32)
    attn_r = 0.1 * jax.random.normal(k5, (HEADS, OUT_DIM), jnp.float32)
    bias = 0.01 * jax.random.normal(k6, (1, HD), jnp.float32)
    gamma = 1.0 + 0.01 * jax.random.normal(k7, (1, HD), jnp.float32)
    beta = 0.01 * jax.random.normal(k8, (1, HD), jnp.float32)

    out = graph_gat_conv(feat, adj, w, attn_l, attn_r, bias, gamma, beta)
    out = jax.block_until_ready(out)

    ref = jax.vmap(reference_single,
                   in_axes=(0, 0, None, None, None, None, None, None))(
        feat, adj, w, attn_l, attn_r, bias, gamma, beta)
    # tolerance absorbs the EUP approximate reciprocal in the edge softmax and
    # the host-side folding of the score projection into the feature matmul
    np.testing.assert_allclose(np.asarray(out), np.asarray(ref),
                               rtol=2e-3, atol=2e-3)
    print("KERNEL_OK")
</pallas_src>

<mosaic_0001>
module attributes {stable_mosaic.version = 11 : i64} {
  func.func @kernel(%arg0: i32, %arg1: memref<1x64x32xf32, #tpu.memory_space<vmem>>, %arg2: memref<1x128x64xf32, #tpu.memory_space<vmem>>, %arg3: memref<32x68xf32, #tpu.memory_space<vmem>>, %arg4: memref<5x64xf32, #tpu.memory_space<vmem>>, %arg5: memref<1x64x32xf32, #tpu.memory_space<vmem>>) attributes {dimension_semantics = [#tpu.dimension_semantics<parallel>], iteration_bounds = array<i64: 1>, scalar_prefetch = 0 : i64, scratch_operands = 0 : i64, tpu.core_type = #tpu.core_type<tc>, window_params = [{transform_indices = @transform_0, window_bounds = array<i64: 1, 64, 32>}, {transform_indices = @transform_1, window_bounds = array<i64: 1, 128, 64>}, {pipeline_mode = #tpu.pipeline_mode<synchronous>, transform_indices = @transform_2, window_bounds = array<i64: 32, 68>}, {pipeline_mode = #tpu.pipeline_mode<synchronous>, transform_indices = @transform_3, window_bounds = array<i64: 5, 64>}, {transform_indices = @transform_4, window_bounds = array<i64: 1, 64, 32>}]} {
    %c0 = arith.constant 0 : index
    %c0_0 = arith.constant 0 : index
    %c0_1 = arith.constant 0 : index
    %0 = vector.load %arg1[%c0, %c0_0, %c0_1] : memref<1x64x32xf32, #tpu.memory_space<vmem>>, vector<1x64x32xf32>
    %1 = vector.shape_cast %0 : vector<1x64x32xf32> to vector<64x32xf32>
    %c0_2 = arith.constant 0 : index
    %c0_3 = arith.constant 0 : index
    %2 = vector.load %arg4[%c0_2, %c0_3] : memref<5x64xf32, #tpu.memory_space<vmem>>, vector<5x64xf32>
    %c0_4 = arith.constant 0 : index
    %c0_5 = arith.constant 0 : index
    %3 = vector.load %arg3[%c0_4, %c0_5] : memref<32x68xf32, #tpu.memory_space<vmem>>, vector<32x68xf32>
    %cst = arith.constant dense<0.000000e+00> : vector<64x68xf32>
    %4 = tpu.matmul %1, %3, %cst {dimension_numbers = #tpu.dot_dimension_numbers<[1], [0], [0], [1], [0, 0, 1, 1], [], []>} : vector<64x32xf32>, vector<32x68xf32>, vector<64x68xf32> -> vector<64x68xf32>
    %5 = vector.extract_strided_slice %4 {offsets = [0, 0], sizes = [64, 64], strides = [1, 1]} : vector<64x68xf32> to vector<64x64xf32>
    %6 = vector.extract_strided_slice %4 {offsets = [0, 64], sizes = [64, 2], strides = [1, 1]} : vector<64x68xf32> to vector<64x2xf32>
    %7 = vector.extract_strided_slice %4 {offsets = [0, 66], sizes = [64, 2], strides = [1, 1]} : vector<64x68xf32> to vector<64x2xf32>
    %8 = tpu.transpose %6, [1, 0] : vector<64x2xf32> -> vector<2x64xf32>
    %9 = vector.extract_strided_slice %8 {offsets = [0, 0], sizes = [1, 64], strides = [1, 1]} : vector<2x64xf32> to vector<1x64xf32>
    %10 = vector.shape_cast %9 : vector<1x64xf32> to vector<1x64xf32>
    %11 = vector.broadcast %10 : vector<1x64xf32> to vector<64x64xf32>
    %12 = vector.extract_strided_slice %8 {offsets = [1, 0], sizes = [1, 64], strides = [1, 1]} : vector<2x64xf32> to vector<1x64xf32>
    %13 = vector.shape_cast %12 : vector<1x64xf32> to vector<1x64xf32>
    %14 = vector.broadcast %13 : vector<1x64xf32> to vector<64x64xf32>
    %15 = tpu.concatenate %11, %14 in 0 : vector<64x64xf32>, vector<64x64xf32> -> vector<128x64xf32>
    %16 = vector.extract_strided_slice %7 {offsets = [0, 0], sizes = [64, 1], strides = [1, 1]} : vector<64x2xf32> to vector<64x1xf32>
    %17 = vector.extract_strided_slice %7 {offsets = [0, 1], sizes = [64, 1], strides = [1, 1]} : vector<64x2xf32> to vector<64x1xf32>
    %18 = tpu.concatenate %16, %17 in 0 : vector<64x1xf32>, vector<64x1xf32> -> vector<128x1xf32>
    %19 = vector.broadcast %18 : vector<128x1xf32> to vector<128x64xf32>
    %20 = arith.addf %19, %15 : vector<128x64xf32>
    %cst_6 = arith.constant 0.000000e+00 : f32
    %21 = vector.broadcast %cst_6 : f32 to vector<128x64xf32>
    %22 = arith.cmpf ogt, %20, %21 : vector<128x64xf32>
    %cst_7 = arith.constant 2.000000e-01 : f32
    %23 = vector.broadcast %cst_7 : f32 to vector<128x64xf32>
    %24 = arith.mulf %23, %20 : vector<128x64xf32>
    %25 = arith.select %22, %20, %24 : vector<128x64xi1>, vector<128x64xf32>
    %c0_8 = arith.constant 0 : index
    %c0_9 = arith.constant 0 : index
    %c0_10 = arith.constant 0 : index
    %26 = vector.load %arg2[%c0_8, %c0_9, %c0_10] : memref<1x128x64xf32, #tpu.memory_space<vmem>>, vector<1x128x64xf32>
    %27 = vector.shape_cast %26 : vector<1x128x64xf32> to vector<128x64xf32>
    %28 = arith.addf %25, %27 : vector<128x64xf32>
    %cst_11 = arith.constant dense<0xFF800000> : vector<128xf32>
    %29 = vector.multi_reduction <maximumf>, %28, %cst_11 [1] : vector<128x64xf32> to vector<128xf32>
    %30 = vector.shape_cast %29 : vector<128xf32> to vector<128x1xf32>
    %31 = vector.broadcast %30 : vector<128x1xf32> to vector<128x64xf32>
    %32 = arith.subf %28, %31 : vector<128x64xf32>
    %33 = math.exp %32 : vector<128x64xf32>
    %cst_12 = arith.constant dense<0.000000e+00> : vector<128xf32>
    %34 = vector.multi_reduction <add>, %33, %cst_12 [1] : vector<128x64xf32> to vector<128xf32>
    %35 = vector.shape_cast %34 : vector<128xf32> to vector<128x1xf32>
    %36 = tpu.reciprocal %35 {approx = true} : vector<128x1xf32> -> vector<128x1xf32>
    %37 = vector.broadcast %36 : vector<128x1xf32> to vector<128x64xf32>
    %38 = arith.mulf %33, %37 : vector<128x64xf32>
    %cst_13 = arith.constant dense<0.000000e+00> : vector<128x64xf32>
    %39 = tpu.matmul %38, %5, %cst_13 {dimension_numbers = #tpu.dot_dimension_numbers<[1], [0], [0], [1], [0, 0, 1, 1], [], []>} : vector<128x64xf32>, vector<64x64xf32>, vector<128x64xf32> -> vector<128x64xf32>
    %cst_14 = arith.constant 0.000000e+00 : f32
    %40 = vector.broadcast %cst_14 : f32 to vector<64x64xf32>
    %41 = vector.extract_strided_slice %2 {offsets = [3, 0], sizes = [1, 64], strides = [1, 1]} : vector<5x64xf32> to vector<1x64xf32>
    %42 = vector.extract_strided_slice %39 {offsets = [0, 0], sizes = [64, 64], strides = [1, 1]} : vector<128x64xf32> to vector<64x64xf32>
    %43 = vector.broadcast %41 : vector<1x64xf32> to vector<64x64xf32>
    %44 = arith.mulf %42, %43 : vector<64x64xf32>
    %45 = arith.addf %40, %44 : vector<64x64xf32>
    %46 = vector.extract_strided_slice %2 {offsets = [4, 0], sizes = [1, 64], strides = [1, 1]} : vector<5x64xf32> to vector<1x64xf32>
    %47 = vector.extract_strided_slice %39 {offsets = [64, 0], sizes = [64, 64], strides = [1, 1]} : vector<128x64xf32> to vector<64x64xf32>
    %48 = vector.broadcast %46 : vector<1x64xf32> to vector<64x64xf32>
    %49 = arith.mulf %47, %48 : vector<64x64xf32>
    %50 = arith.addf %45, %49 : vector<64x64xf32>
    %51 = vector.extract_strided_slice %2 {offsets = [0, 0], sizes = [1, 64], strides = [1, 1]} : vector<5x64xf32> to vector<1x64xf32>
    %52 = vector.broadcast %51 : vector<1x64xf32> to vector<64x64xf32>
    %53 = arith.addf %50, %52 : vector<64x64xf32>
    %cst_15 = arith.constant dense<0.000000e+00> : vector<64xf32>
    %54 = vector.multi_reduction <add>, %53, %cst_15 [1] : vector<64x64xf32> to vector<64xf32>
    %55 = vector.shape_cast %54 : vector<64xf32> to vector<64x1xf32>
    %cst_16 = arith.constant 6.400000e+01 : f32
    %56 = vector.broadcast %cst_16 : f32 to vector<64x1xf32>
    %57 = arith.divf %55, %56 : vector<64x1xf32>
    %58 = vector.broadcast %57 : vector<64x1xf32> to vector<64x64xf32>
    %59 = arith.subf %53, %58 : vector<64x64xf32>
    %60 = arith.mulf %59, %59 : vector<64x64xf32>
    %cst_17 = arith.constant dense<0.000000e+00> : vector<64xf32>
    %61 = vector.multi_reduction <add>, %60, %cst_17 [1] : vector<64x64xf32> to vector<64xf32>
    %62 = vector.shape_cast %61 : vector<64xf32> to vector<64x1xf32>
    %cst_18 = arith.constant 6.400000e+01 : f32
    %63 = vector.broadcast %cst_18 : f32 to vector<64x1xf32>
    %64 = arith.divf %62, %63 : vector<64x1xf32>
    %65 = vector.broadcast %57 : vector<64x1xf32> to vector<64x64xf32>
    %66 = arith.subf %53, %65 : vector<64x64xf32>
    %cst_19 = arith.constant 9.99999974E-6 : f32
    %67 = vector.broadcast %cst_19 : f32 to vector<64x1xf32>
    %68 = arith.addf %64, %67 : vector<64x1xf32>
    %69 = math.rsqrt %68 : vector<64x1xf32>
    %70 = vector.broadcast %69 : vector<64x1xf32> to vector<64x64xf32>
    %71 = arith.mulf %66, %70 : vector<64x64xf32>
    %72 = vector.extract_strided_slice %2 {offsets = [1, 0], sizes = [1, 64], strides = [1, 1]} : vector<5x64xf32> to vector<1x64xf32>
    %73 = vector.broadcast %72 : vector<1x64xf32> to vector<64x64xf32>
    %74 = arith.mulf %71, %73 : vector<64x64xf32>
    %75 = vector.extract_strided_slice %2 {offsets = [2, 0], sizes = [1, 64], strides = [1, 1]} : vector<5x64xf32> to vector<1x64xf32>
    %76 = vector.broadcast %75 : vector<1x64xf32> to vector<64x64xf32>
    %77 = arith.addf %74, %76 : vector<64x64xf32>
    %cst_20 = arith.constant 0.000000e+00 : f32
    %78 = vector.broadcast %cst_20 : f32 to vector<64x64xf32>
    %79 = arith.cmpf ogt, %77, %78 : vector<64x64xf32>
    %80 = math.exp %77 : vector<64x64xf32>
    %cst_21 = arith.constant 1.000000e+00 : f32
    %81 = vector.broadcast %cst_21 : f32 to vector<64x64xf32>
    %82 = arith.subf %80, %81 : vector<64x64xf32>
    %83 = arith.select %79, %77, %82 : vector<64x64xi1>, vector<64x64xf32>
    %84 = vector.extract_strided_slice %83 {offsets = [0, 0], sizes = [64, 32], strides = [1, 1]} : vector<64x64xf32> to vector<64x32xf32>
    %85 = vector.extract_strided_slice %83 {offsets = [0, 32], sizes = [64, 32], strides = [1, 1]} : vector<64x64xf32> to vector<64x32xf32>
    %86 = arith.addf %84, %85 : vector<64x32xf32>
    %cst_22 = arith.constant 5.000000e-01 : f32
    %87 = vector.broadcast %cst_22 : f32 to vector<64x32xf32>
    %88 = arith.mulf %86, %87 : vector<64x32xf32>
    %c0_23 = arith.constant 0 : index
    %c0_24 = arith.constant 0 : index
    %c0_25 = arith.constant 0 : index
    %89 = vector.load %arg5[%c0_23, %c0_24, %c0_25] : memref<1x64x32xf32, #tpu.memory_space<vmem>>, vector<1x64x32xf32>
    %90 = vector.shape_cast %89 : vector<1x64x32xf32> to vector<64x32xf32>
    %91 = vector.shape_cast %88 : vector<64x32xf32> to vector<1x64x32xf32>
    tpu.vector_store %arg5[%c0_23, %c0_24, %c0_25], %91 {strides = array<i32>} : memref<1x64x32xf32, #tpu.memory_space<vmem>>, vector<1x64x32xf32>,
    return
  }
  func.func @transform_0(%arg0: i32) -> (i32, i32, i32) {
    %c0_i32 = arith.constant 0 : i32
    %c0_i32_0 = arith.constant 0 : i32
    %c0_i32_1 = arith.constant 0 : i32
    return %arg0, %c0_i32, %c0_i32_0 : i32, i32, i32
  }
  func.func @transform_1(%arg0: i32) -> (i32, i32, i32) {
    %c0_i32 = arith.constant 0 : i32
    %c0_i32_0 = arith.constant 0 : i32
    %c0_i32_1 = arith.constant 0 : i32
    return %arg0, %c0_i32, %c0_i32_0 : i32, i32, i32
  }
  func.func @transform_2(%arg0: i32) -> (i32, i32) {
    %c0_i32 = arith.constant 0 : i32
    %c0_i32_0 = arith.constant 0 : i32
    %c0_i32_1 = arith.constant 0 : i32
    return %c0_i32, %c0_i32_0 : i32, i32
  }
  func.func @transform_3(%arg0: i32) -> (i32, i32) {
    %c0_i32 = arith.constant 0 : i32
    %c0_i32_0 = arith.constant 0 : i32
    %c0_i32_1 = arith.constant 0 : i32
    return %c0_i32, %c0_i32_0 : i32, i32
  }
  func.func @transform_4(%arg0: i32) -> (i32, i32, i32) {
    %c0_i32 = arith.constant 0 : i32
    %c0_i32_0 = arith.constant 0 : i32
    %c0_i32_1 = arith.constant 0 : i32
    return %arg0, %c0_i32, %c0_i32_0 : i32, i32, i32
  }
}

</mosaic_0001>

<bundles_post_ra>
// kernel: tpu_custom_call.1
= control target key start
LH: loop header
LB: loop body
LE: loop exit
PB: predicated region body
PF: predicated region fallthrough
CT: control target
= control target key end

     0   :  { %vm30_vm0 = vcmask 261120   ;;  %v1127_v8 = vmov 66   ;;  %s1128_s12 = smov 64   ;;  %s1129_s13 = smov 127   ;;  %vm338_vm3 = vcmask 523264   ;;  %s1649_s2 = inlined_call_operand.vmem [shape: f32[32,68], index: 2, kind: input, shape index: {}]   ;;  %s1650_s0 = inlined_call_operand.vmem [shape: f32[1,64,32], index: 0, kind: input, shape index: {}]   ;;  %s1651_s1 = inlined_call_operand.vmem [shape: f32[1,128,64], index: 1, kind: input, shape index: {}]   ;;  %s1652_s3 = inlined_call_operand.vmem [shape: f32[5,64], index: 3, kind: input, shape index: {}]   ;;  %s1653_s4 = inlined_call_operand.vmem [shape: f32[1,64,32], index: 4, kind: output, shape index: {}]  }
   0x1   :  { %v29_v0 = vld [vmem:[%s1649_s2 + $0x18] sm:$0xff]  ;;  %v28_v1 = vld [vmem:[%s1649_s2 + $0x10] sm:$0xff]  ;;  %v27_v2 = vld [vmem:[%s1649_s2 + $0x8] sm:$0xff]  ;;  %1026 = vset.pattern.permute.xlu2 %v1127_v8  ;;  %1027 = vset.pattern.permute.xlu1 %v1127_v8 }
   0x2   :  { %67 = vmatpush.msra.mxu0 %v29_v0  ;;  %v26_v3 = vld [vmem:[%s1649_s2] sm:$0xff]  ;;  %v18_v5 = vld [vmem:[%s1650_s0 + $0x8] sm:$0xff]  ;;  %v19_v6 = vld [vmem:[%s1650_s0 + $0x10] sm:$0xff]  ;;  %1028 = vset.pattern.permute.xlu0 %v1127_v8 }
   0x3   :  { %v17_v4 = vld [vmem:[%s1650_s0] sm:$0xff]  ;;  %v20_v7 = vld [vmem:[%s1650_s0 + $0x18] sm:$0xff]  ;;  %v22_v10 = vld [vmem:[%s1650_s0 + $0x28] sm:$0xff] }
   0x4   :  { %68 = vmatpush.msra.mxu0 %v28_v1  ;;  %v21_v9 = vld [vmem:[%s1650_s0 + $0x20] sm:$0xff]  ;;  %v23_v11 = vld [vmem:[%s1650_s0 + $0x30] sm:$0xff]  ;;  %v24_v12 = vld [vmem:[%s1650_s0 + $0x38] sm:$0xff] }
   0x5   :  { %v312_v53 = vld [vmem:[%s1651_s1 + $0x30] sm:$0xff]  ;;  %v306_v54 = vld [vmem:[%s1651_s1] sm:$0xff] }
   0x6   :  { %69 = vmatpush.msra.mxu0 %v27_v2 }
   0x8   :  { %70 = vmatpush.msra.mxu0 %v26_v3  ;;  %v314_v3 = vld [vmem:[%s1651_s1 + $0x40] sm:$0xff] }
   0x9   :  { %972 = vmatmul.msk.f32.vlgmr.msra.gmra.mxu0 %vm30_vm0, %v17_v4 }
  0x11   :  { %973 = vmatmul.msk.f32.gmra.mxu0 %vm30_vm0, %v18_v5 }
  0x19   :  { %974 = vmatmul.msk.f32.gmra.mxu0 %vm30_vm0, %v19_v6 }
  0x21   :  { %975 = vmatmul.msk.f32.gmra.mxu0 %vm30_vm0, %v20_v7 }
  0x29   :  { %976 = vmatmul.msk.f32.gmra.mxu0 %vm30_vm0, %v21_v9 }
  0x31   :  { %977 = vmatmul.msk.f32.gmra.mxu0 %vm30_vm0, %v22_v10  ;;  %v307_v10 = vld [vmem:[%s1651_s1 + $0x8] sm:$0xff] }
  0x39   :  { %978 = vmatmul.msk.f32.gmra.mxu0 %vm30_vm0, %v23_v11 }
  0x41   :  { %979 = vmatmul.msk.f32.gmra.mxu0 %vm30_vm0, %v24_v12  ;;  %v313_v12 = vld [vmem:[%s1651_s1 + $0x38] sm:$0xff] }
  0x86   :  { %v72_v13 = vpop.f32.mrf.mxu0 }
  0x87   :  { %179 = vperm.xlu2 %1026, %v72_v13   ;;  %104 = vrot.lane.b32.xlu0 %v72_v13, %s1128_s12 }
  0x8e   :  { %v75_v14 = vpop.f32.mrf.mxu0 }
  0x8f   :  { %162 = vrot.lane.b32.xlu0 %v72_v13, %s1129_s13  ;;  %164 = vrot.lane.b32.xlu1 %v75_v14, %s1129_s13 }
  0x96   :  { %v78_v15 = vpop.f32.mrf.mxu0 }
  0x97   :  { %183 = vperm.xlu1 %1027, %v75_v14   ;;  %106 = vrot.lane.b32.xlu0 %v75_v14, %s1128_s12 }
  0x9e   :  { %v81_v16 = vpop.f32.mrf.mxu0 }
  0x9f   :  { %166 = vrot.lane.b32.xlu0 %v78_v15, %s1129_s13  ;;  %108 = vrot.lane.b32.xlu1 %v78_v15, %s1128_s12 }
  0xa6   :  { %v84_v17 = vpop.f32.mrf.mxu0 }
  0xa7   :  { %187 = vperm.xlu0 %1028, %v78_v15   ;;  %110 = vrot.lane.b32.xlu1 %v81_v16, %s1128_s12 }
  0xa8   :  { %112 = vrot.lane.b32.xlu2 %v84_v17, %s1128_s12 }
  0xae   :  { %v87_v18 = vpop.f32.mrf.mxu0 }
  0xaf   :  { %168 = vrot.lane.b32.xlu0 %v81_v16, %s1129_s13  ;;  %191 = vperm.xlu1 %1027, %v81_v16  }
  0xb0   :  { %114 = vrot.lane.b32.xlu2 %v87_v18, %s1128_s12 }
  0xb6   :  { %v90_v19 = vpop.f32.mrf.mxu0 }
  0xb7   :  { %170 = vrot.lane.b32.xlu1 %v84_v17, %s1129_s13  ;;  %195 = vperm.xlu0 %1028, %v84_v17  }
  0xb8   :  { %172 = vrot.lane.b32.xlu2 %v87_v18, %s1129_s13 }
  0xbe   :  { %v93_v20 = vpop.f32.mrf.mxu0 }
  0xbf   :  { %199 = vperm.xlu1 %1027, %v87_v18   ;;  %571 = vmatpush.msra.mxu1 %v93_v20 }
  0xc0   :  { %1004 = vmatpush.msra.mxu2 %v93_v20  ;;  %1005 = vmatpush.msra.mxu3 %v93_v20 }
  0xc1   :  { %572 = vmatpush.msra.mxu1 %v90_v19  ;;  %116 = vrot.lane.b32.xlu2 %v90_v19, %s1128_s12 }
  0xc2   :  { %1006 = vmatpush.msra.mxu2 %v90_v19  ;;  %1007 = vmatpush.msra.mxu3 %v90_v19 }
  0xc3   :  { %573 = vmatpush.msra.mxu1 %v87_v18  ;;  %118 = vrot.lane.b32.xlu0 %v93_v20, %s1128_s12 }
  0xc4   :  { %1008 = vmatpush.msra.mxu2 %v87_v18  ;;  %1009 = vmatpush.msra.mxu3 %v87_v18 }
  0xc5   :  { %574 = vmatpush.msra.mxu1 %v84_v17 }
  0xc6   :  { %1010 = vmatpush.msra.mxu2 %v84_v17  ;;  %1011 = vmatpush.msra.mxu3 %v84_v17 }
  0xc7   :  { %174 = vrot.lane.b32.xlu1 %v90_v19, %s1129_s13  ;;  %575 = vmatpush.msra.mxu1 %v81_v16 }
  0xc8   :  { %1012 = vmatpush.msra.mxu2 %v81_v16  ;;  %1013 = vmatpush.msra.mxu3 %v81_v16 }
  0xc9   :  { %576 = vmatpush.msra.mxu1 %v78_v15  ;;  %203 = vperm.xlu2 %1026, %v90_v19  }
  0xca   :  { %1014 = vmatpush.msra.mxu2 %v78_v15  ;;  %1015 = vmatpush.msra.mxu3 %v78_v15 }
  0xcb   :  { %577 = vmatpush.msra.mxu1 %v75_v14  ;;  %207 = vperm.xlu0 %1028, %v93_v20  }
  0xcc   :  { %1016 = vmatpush.msra.mxu2 %v75_v14  ;;  %1017 = vmatpush.msra.mxu3 %v75_v14 }
  0xcd   :  { %578 = vmatpush.msra.mxu1 %v72_v13 }
  0xce   :  { %1018 = vmatpush.msra.mxu2 %v72_v13  ;;  %1019 = vmatpush.msra.mxu3 %v72_v13 }
  0xcf   :  { %176 = vrot.lane.b32.xlu1 %v93_v20, %s1129_s13 }
  0xe1   :  { %v180_v22 = vpop.permute.xlu2 %179 }
  0xf9   :  { %v105_v21 = vpop.permute.xlu0 %104 }
 0x101   :  { %v163_v23 = vpop.permute.xlu0 %162  ;;  %v165_v24 = vpop.permute.xlu1 %164 }
 0x102   :  { %211 = vperm.xlu2 %1026, %v163_v23   ;;  %215 = vperm.xlu1 %1027, %v165_v24   ;;  %v113_v25 = vpop.permute.xlu2 %112  ;;  %v308_v23 = vld [vmem:[%s1651_s1 + $0x10] sm:$0xff] }
 0x109   :  { %v184_v26 = vpop.permute.xlu1 %183  ;;  %v107_v27 = vpop.permute.xlu0 %106 }
 0x10a   :  { %v115_v28 = vpop.permute.xlu2 %114 }
 0x111   :  { %v167_v29 = vpop.permute.xlu0 %166  ;;  %v109_v30 = vpop.permute.xlu1 %108 }
 0x112   :  { %219 = vperm.xlu0 %1028, %v167_v29   ;;  %v173_v31 = vpop.permute.xlu2 %172 }
 0x119   :  { %v188_v32 = vpop.permute.xlu0 %187  ;;  %v111_v33 = vpop.permute.xlu1 %110 }
 0x11a   :  { %231 = vperm.xlu0 %1028, %v173_v31  }
 0x11b   :  { %v117_v41 = vpop.permute.xlu2 %116 }
 0x121   :  { %v169_v34 = vpop.permute.xlu0 %168  ;;  %v192_v35 = vpop.permute.xlu1 %191 }
 0x122   :  { %223 = vperm.xlu1 %1027, %v169_v34  }
 0x123   :  { %v204_v43 = vpop.permute.xlu2 %203 }
 0x128   :  { %128 = vxpose.xlu2.b32.start [1/8] (short) (narrow) %v105_v21, 8 }
 0x129   :  { %v171_v36 = vpop.permute.xlu1 %170  ;;  %v196_v40 = vpop.permute.xlu0 %195 }
 0x12a   :  { %227 = vperm.xlu1 %1027, %v171_v36  }
 0x130   :  { %129 = vxpose.xlu2.b32.cont [2/8] (short) (narrow) %v107_v27, 8 }
 0x131   :  { %v1217_v37 = vpop.permute.xlu1 %199 }
 0x135   :  { %v119_v42 = vpop.permute.xlu0 %118 }
 0x138   :  { %130 = vxpose.xlu2.b32.cont [3/8] (short) (narrow) %v109_v30, 8 }
 0x139   :  { %v175_v38 = vpop.permute.xlu1 %174 }
 0x13a   :  { %235 = vperm.xlu1 %1027, %v175_v38   ;;  %v310_v38 = vld [vmem:[%s1651_s1 + $0x20] sm:$0xff] }
 0x13d   :  { %v208_v48 = vpop.permute.xlu0 %207 }
 0x140   :  { %131 = vxpose.xlu2.b32.cont [4/8] (short) (narrow) %v111_v33, 8 }
 0x141   :  { %v177_v39 = vpop.permute.xlu1 %176 }
 0x142   :  { %239 = vperm.xlu0 %1028, %v177_v39  }
 0x148   :  { %132 = vxpose.xlu2.b32.cont [5/8] (short) (narrow) %v113_v25, 8  ;;  %v309_v25 = vld [vmem:[%s1651_s1 + $0x18] sm:$0xff] }
 0x150   :  { %133 = vxpose.xlu2.b32.cont [6/8] (short) (narrow) %v115_v28, 8 }
 0x158   :  { %134 = vxpose.xlu2.b32.cont [7/8] (short) (narrow) %v117_v41, 8 }
 0x15c   :  { %v212_v44 = vpop.permute.xlu2 %211 }
 0x160   :  { %135 = vxpose.xlu2.b32.end [8/8] (short) (narrow) %v119_v42, 8 }
 0x174   :  { %v216_v59 = vpop.permute.xlu1 %215 }
 0x184   :  { %v220_v31 = vpop.permute.xlu0 %219 }
 0x194   :  { %v224_v15 = vpop.permute.xlu1 %223 }
 0x1c1   :  { %v144_v45 = vpop.trf.xlu2 }
 0x1c2   :  { %v1219_v46 = vperm.slane %v144_v45, 0  ;;  %v1221_v47 = vperm.slane %v144_v45, 1 }
 0x1c4   :  { %v248_v49 = vadd.f32 %v204_v43, %v1219_v46  ;;  %v242_v50 = vadd.f32 %v180_v22, %v1219_v46  ;;  %v250_v51 = vadd.f32 %v212_v44, %v1221_v47  ;;  %v243_v52 = vadd.f32 %v184_v26, %v1219_v46 }
 0x1c5   :  { %v249_v55 = vadd.f32 %v208_v48, %v1219_v46  ;;  %v244_v6 = vadd.f32 %v188_v32, %v1219_v46  ;;  %v245_v7 = vadd.f32 %v192_v35, %v1219_v46  ;;  %v246_v21 = vadd.f32 %v196_v40, %v1219_v46  ;;  %v228_v32 = vpop.permute.xlu1 %227  ;;  %v315_v40 = vld [vmem:[%s1651_s1 + $0x48] sm:$0xff]  ;;  %v232_v48 = vpop.permute.xlu0 %231 }
 0x1c6   :  { %vm264_vm1 = vcmp.gt.f32.partialorder %v248_v49, 0.0  ;;  %v280_v56 = vmul.f32 0.2, %v248_v49  ;;  %vm258_vm2 = vcmp.gt.f32.partialorder %v242_v50, 0.0  ;;  %v274_v57 = vmul.f32 0.2, %v242_v50 }
 0x1c7   :  { %vm266_vm4 = vcmp.gt.f32.partialorder %v250_v51, 0.0  ;;  %v282_v58 = vmul.f32 0.2, %v250_v51  ;;  %vm259_vm5 = vcmp.gt.f32.partialorder %v243_v52, 0.0  ;;  %v275_v62 = vmul.f32 0.2, %v243_v52 }
 0x1c8   :  { %v296_v60 = vsel %vm264_vm1, %v248_v49, %v280_v56  ;;  %v290_v61 = vsel %vm258_vm2, %v242_v50, %v274_v57  ;;  %v281_v63 = vmul.f32 0.2, %v249_v55  ;;  %vm265_vm6 = vcmp.gt.f32.partialorder %v249_v55, 0.0 }
 0x1c9   :  { %v1234_v0 = vadd.f32 %v312_v53, %v296_v60  ;;  %v1236_v1 = vadd.f32 %v306_v54, %v290_v61  ;;  %v298_v2 = vsel %vm266_vm4, %v250_v51, %v282_v58  ;;  %v291_v9 = vsel %vm259_vm5, %v243_v52, %v275_v62  ;;  %v318_v53 = vld [vmem:[%s1651_s1 + $0x60] sm:$0xff] }
 0x1ca   :  { %v1247_v8 = vadd.f32 %v314_v3, %v298_v2  ;;  %v297_v11 = vsel %vm265_vm6, %v249_v55, %v281_v63  ;;  %v1256_v13 = vadd.f32 %v307_v10, %v291_v9  ;;  %v276_v17 = vmul.f32 0.2, %v244_v6  ;;  %v316_v55 = vld [vmem:[%s1651_s1 + $0x50] sm:$0xff] }
 0x1cb   :  { %v357_v4 = vsel %vm338_vm3, %v1234_v0, -inf  ;;  %v339_v5 = vsel %vm338_vm3, %v1236_v1, -inf  ;;  %v1258_v14 = vadd.f32 %v313_v12, %v297_v11  ;;  %v277_v18 = vmul.f32 0.2, %v245_v7 }
 0x1cc   :  { %358 = vmax.xlane.f32.xlu0 %v357_v4  ;;  %340 = vmax.xlane.f32.xlu1 %v339_v5  ;;  %v363_v16 = vsel %vm338_vm3, %v1247_v8, -inf  ;;  %vm260_vm7 = vcmp.gt.f32.partialorder %v244_v6, 0.0  ;;  %vm261_vm8 = vcmp.gt.f32.partialorder %v245_v7, 0.0  ;;  %v342_v19 = vsel %vm338_vm3, %v1256_v13, -inf  ;;  %v317_v5 = vld [vmem:[%s1651_s1 + $0x58] sm:$0xff] }
 0x1cd   :  { %v360_v20 = vsel %vm338_vm3, %v1258_v14, -inf  ;;  %v292_v22 = vsel %vm260_vm7, %v244_v6, %v276_v17  ;;  %v293_v24 = vsel %vm261_vm8, %v245_v7, %v277_v18  ;;  %v251_v26 = vadd.f32 %v216_v59, %v1221_v47  ;;  %v236_v61 = vpop.permute.xlu1 %235  ;;  %v240_v62 = vpop.permute.xlu0 %239  ;;  %v319_v7 = vld [vmem:[%s1651_s1 + $0x68] sm:$0xff] }
 0x1ce   :  { %v1274_v27 = vadd.f32 %v308_v23, %v292_v22  ;;  %v1276_v28 = vadd.f32 %v309_v25, %v293_v24  ;;  %v278_v29 = vmul.f32 0.2, %v246_v21  ;;  %vm262_vm9 = vcmp.gt.f32.partialorder %v246_v21, 0.0 }
 0x1cf   :  { %v283_v30 = vmul.f32 0.2, %v251_v26  ;;  %vm267_vm10 = vcmp.gt.f32.partialorder %v251_v26, 0.0  ;;  %v254_v35 = vadd.f32 %v228_v32, %v1221_v47  ;;  %v252_v41 = vadd.f32 %v220_v31, %v1221_v47 }
 0x1d0   :  { %v345_v33 = vsel %vm338_vm3, %v1274_v27, -inf  ;;  %v348_v34 = vsel %vm338_vm3, %v1276_v28, -inf  ;;  %v294_v36 = vsel %vm262_vm9, %v246_v21, %v278_v29  ;;  %v253_v51 = vadd.f32 %v224_v15, %v1221_v47 }
 0x1d1   :  { %364 = vmax.xlane.f32.xlu2 %v363_v16  ;;  %v299_v39 = vsel %vm267_vm10, %v251_v26, %v283_v30  ;;  %v1290_v42 = vadd.f32 %v310_v38, %v294_v36  ;;  %v286_v44 = vmul.f32 0.2, %v254_v35  ;;  %v284_v45 = vmul.f32 0.2, %v252_v41  ;;  %v311_v30 = vld [vmem:[%s1651_s1 + $0x28] sm:$0xff] }
 0x1d2   :  { %v1292_v43 = vadd.f32 %v315_v40, %v299_v39  ;;  %vm270_vm11 = vcmp.gt.f32.partialorder %v254_v35, 0.0  ;;  %vm268_vm12 = vcmp.gt.f32.partialorder %v252_v41, 0.0  ;;  %v255_v56 = vadd.f32 %v232_v48, %v1221_v47 }
 0x1d3   :  { %v351_v49 = vsel %vm338_vm3, %v1290_v42, -inf  ;;  %v302_v52 = vsel %vm270_vm11, %v254_v35, %v286_v44  ;;  %v300_v54 = vsel %vm268_vm12, %v252_v41, %v284_v45  ;;  %v285_v59 = vmul.f32 0.2, %v253_v51 }
 0x1d4   :  { %343 = vmax.xlane.f32.xlu1 %v342_v19  ;;  %361 = vmax.xlane.f32.xlu0 %v360_v20  ;;  %v366_v50 = vsel %vm338_vm3, %v1292_v43, -inf  ;;  %v1306_v57 = vadd.f32 %v318_v53, %v302_v52  ;;  %v1308_v58 = vadd.f32 %v316_v55, %v300_v54  ;;  %v287_v60 = vmul.f32 0.2, %v255_v56  ;;  %v321_v20 = vld [vmem:[%s1651_s1 + $0x78] sm:$0xff] }
 0x1d5   :  { %vm269_vm13 = vcmp.gt.f32.partialorder %v253_v51, 0.0  ;;  %vm271_vm14 = vcmp.gt.f32.partialorder %v255_v56, 0.0  ;;  %v256_v3 = vadd.f32 %v236_v61, %v1221_v47  ;;  %v257_v9 = vadd.f32 %v240_v62, %v1221_v47  ;;  %v320_v47 = vld [vmem:[%s1651_s1 + $0x70] sm:$0xff] }
 0x1d6   :  { %v375_v63 = vsel %vm338_vm3, %v1306_v57, -inf  ;;  %v369_v2 = vsel %vm338_vm3, %v1308_v58, -inf  ;;  %v301_v4 = vsel %vm269_vm13, %v253_v51, %v285_v59  ;;  %v303_v6 = vsel %vm271_vm14, %v255_v56, %v287_v60 }
 0x1d7   :  { %v1322_v10 = vadd.f32 %v317_v5, %v301_v4  ;;  %v1324_v11 = vadd.f32 %v319_v7, %v303_v6  ;;  %v288_v12 = vmul.f32 0.2, %v256_v3  ;;  %v289_v15 = vmul.f32 0.2, %v257_v9 }
 0x1d8   :  { %vm272_vm15 = vcmp.gt.f32.partialorder %v256_v3, 0.0  ;;  %vm273_vm1 = vcmp.gt.f32.partialorder %v257_v9, 0.0  ;;  %v247_v21 = vadd.f32 %v1217_v37, %v1219_v46 }
 0x1d9   :  { %v372_v16 = vsel %vm338_vm3, %v1322_v10, -inf  ;;  %v378_v17 = vsel %vm338_vm3, %v1324_v11, -inf  ;;  %v304_v18 = vsel %vm272_vm15, %v256_v3, %v288_v12  ;;  %v305_v19 = vsel %vm273_vm1, %v257_v9, %v289_v15 }
 0x1da   :  { %v1338_v22 = vadd.f32 %v320_v47, %v304_v18  ;;  %v1340_v23 = vadd.f32 %v321_v20, %v305_v19  ;;  %v279_v24 = vmul.f32 0.2, %v247_v21  ;;  %vm263_vm2 = vcmp.gt.f32.partialorder %v247_v21, 0.0 }
 0x1dc   :  { %346 = vmax.xlane.f32.xlu1 %v345_v33  ;;  %349 = vmax.xlane.f32.xlu0 %v348_v34  ;;  %v381_v25 = vsel %vm338_vm3, %v1338_v22, -inf  ;;  %v384_v26 = vsel %vm338_vm3, %v1340_v23, -inf  ;;  %v295_v29 = vsel %vm263_vm2, %v247_v21, %v279_v24 }
 0x1dd   :  { %v1349_v37 = vadd.f32 %v311_v30, %v295_v29 }
 0x1df   :  { %v354_v46 = vsel %vm338_vm3, %v1349_v37, -inf }
 0x1e4   :  { %352 = vmax.xlane.f32.xlu1 %v351_v49  ;;  %367 = vmax.xlane.f32.xlu0 %v366_v50 }
 0x1ec   :  { %376 = vmax.xlane.f32.xlu0 %v375_v63  ;;  %370 = vmax.xlane.f32.xlu1 %v369_v2 }
 0x1f4   :  { %373 = vmax.xlane.f32.xlu0 %v372_v16  ;;  %379 = vmax.xlane.f32.xlu1 %v378_v17 }
 0x1fc   :  { %382 = vmax.xlane.f32.xlu0 %v381_v25  ;;  %385 = vmax.xlane.f32.xlu1 %v384_v26 }
 0x204   :  { %355 = vmax.xlane.f32.xlu0 %v354_v46 }
 0x23f   :  { %v341_v31 = vpop.xlane.xlu1 %340  ;;  %v359_v32 = vpop.xlane.xlu0 %358 }
 0x240   :  { %v387_v33 = vsub.f32 %v1236_v1, %v341_v31  ;;  %v393_v34 = vsub.f32 %v1234_v0, %v359_v32 }
 0x242   :  { %v403_v35 = vmul.f32 1.442695, %v387_v33  ;;  %v415_v36 = vmul.f32 1.442695, %v393_v34 }
 0x244   :  { %1029 = vpow2.f32 %v403_v35  ;;  %v365_v51 = vpop.xlane.xlu2 %364 }
 0x245   :  { %1031 = vpow2.f32 %v415_v36  ;;  %v395_v55 = vsub.f32 %v1247_v8, %v365_v51 }
 0x247   :  { %v344_v38 = vpop.xlane.xlu1 %343  ;;  %v362_v39 = vpop.xlane.xlu0 %361  ;;  %v419_v60 = vmul.f32 1.442695, %v395_v55 }
 0x248   :  { %v388_v40 = vsub.f32 %v1256_v13, %v344_v38  ;;  %v394_v41 = vsub.f32 %v1258_v14, %v362_v39 }
 0x24a   :  { %v1357_v44 = vpop.eup %1029  ;;  %v405_v45 = vmul.f32 1.442695, %v388_v40  ;;  %v417_v48 = vmul.f32 1.442695, %v394_v41 }
 0x24b   :  { %v1359_v49 = vpop.eup %1031  ;;  %v435_v1 = vsel %vm338_vm3, %v1357_v44, 0.0 }
 0x24c   :  { %1033 = vpow2.f32 %v405_v45  ;;  %436 = vadd.xlane.f32.xlu0 %v435_v1  ;;  %v453_v0 = vsel %vm338_vm3, %v1359_v49, 0.0 }
 0x24d   :  { %1035 = vpow2.f32 %v417_v48  ;;  %454 = vadd.xlane.f32.xlu1 %v453_v0 }
 0x24f   :  { %v347_v50 = vpop.xlane.xlu1 %346  ;;  %v350_v13 = vpop.xlane.xlu0 %349 }
 0x250   :  { %v389_v14 = vsub.f32 %v1274_v27, %v347_v50  ;;  %v390_v15 = vsub.f32 %v1276_v28, %v350_v13 }
 0x252   :  { %v1366_v52 = vpop.eup %1033  ;;  %v407_v53 = vmul.f32 1.442695, %v389_v14 }
 0x253   :  { %v1368_v54 = vpop.eup %1035  ;;  %v438_v56 = vsel %vm338_vm3, %v1366_v52, 0.0 }
 0x254   :  { %1037 = vpow2.f32 %v407_v53  ;;  %439 = vadd.xlane.f32.xlu0 %v438_v56  ;;  %v456_v59 = vsel %vm338_vm3, %v1368_v54, 0.0 }
 0x255   :  { %457 = vadd.xlane.f32.xlu1 %v456_v59  ;;  %1039 = vpow2.f32 %v419_v60 }
 0x257   :  { %v353_v61 = vpop.xlane.xlu1 %352  ;;  %v368_v62 = vpop.xlane.xlu0 %367 }
 0x258   :  { %v396_v27 = vsub.f32 %v1292_v43, %v368_v62  ;;  %v391_v28 = vsub.f32 %v1290_v42, %v353_v61 }
 0x25a   :  { %v1376_v63 = vpop.eup %1037  ;;  %v421_v2 = vmul.f32 1.442695, %v396_v27  ;;  %v411_v26 = vmul.f32 1.442695, %v391_v28 }
 0x25b   :  { %v441_v8 = vsel %vm338_vm3, %v1376_v63, 0.0  ;;  %v1382_v7 = vpop.eup %1039 }
 0x25c   :  { %1041 = vpow2.f32 %v421_v2  ;;  %v459_v16 = vsel %vm338_vm3, %v1382_v7, 0.0 }
 0x25d   :  { %442 = vadd.xlane.f32.xlu1 %v441_v8 }
 0x25f   :  { %v371_v3 = vpop.xlane.xlu1 %370  ;;  %v377_v4 = vpop.xlane.xlu0 %376 }
 0x260   :  { %v397_v5 = vsub.f32 %v1308_v58, %v371_v3  ;;  %v399_v6 = vsub.f32 %v1306_v57, %v377_v4  ;;  %v409_v58 = vmul.f32 1.442695, %v390_v15 }
 0x262   :  { %v423_v9 = vmul.f32 1.442695, %v397_v5  ;;  %v427_v12 = vmul.f32 1.442695, %v399_v6  ;;  %v1384_v43 = vpop.eup %1041 }
 0x263   :  { %v462_v17 = vsel %vm338_vm3, %v1384_v43, 0.0 }
 0x264   :  { %1043 = vpow2.f32 %v423_v9  ;;  %463 = vadd.xlane.f32.xlu0 %v462_v17 }
 0x265   :  { %1045 = vpow2.f32 %v427_v12  ;;  %460 = vadd.xlane.f32.xlu1 %v459_v16 }
 0x266   :  { %1047 = vpow2.f32 %v409_v58 }
 0x267   :  { %v380_v57 = vpop.xlane.xlu1 %379  ;;  %v374_v18 = vpop.xlane.xlu0 %373 }
 0x268   :  { %v400_v47 = vsub.f32 %v1324_v11, %v380_v57  ;;  %v398_v42 = vsub.f32 %v1322_v10, %v374_v18 }
 0x26a   :  { %v1392_v19 = vpop.eup %1043  ;;  %v429_v20 = vmul.f32 1.442695, %v400_v47 }
 0x26b   :  { %v1394_v21 = vpop.eup %1045  ;;  %v465_v24 = vsel %vm338_vm3, %v1392_v19, 0.0 }
 0x26c   :  { %1049 = vpow2.f32 %v429_v20  ;;  %v471_v25 = vsel %vm338_vm3, %v1394_v21, 0.0  ;;  %v1402_v46 = vpop.eup %1047 }
 0x26d   :  { %466 = vadd.xlane.f32.xlu1 %v465_v24  ;;  %472 = vadd.xlane.f32.xlu0 %v471_v25  ;;  %1051 = vpow2.f32 %v411_v26  ;;  %v444_v35 = vsel %vm338_vm3, %v1402_v46, 0.0 }
 0x26f   :  { %v383_v29 = vpop.xlane.xlu0 %382  ;;  %v386_v11 = vpop.xlane.xlu1 %385 }
 0x270   :  { %v401_v30 = vsub.f32 %v1338_v22, %v383_v29  ;;  %v402_v33 = vsub.f32 %v1340_v23, %v386_v11  ;;  %v425_v22 = vmul.f32 1.442695, %v398_v42 }
 0x272   :  { %v1404_v31 = vpop.eup %1049  ;;  %v431_v32 = vmul.f32 1.442695, %v401_v30  ;;  %v433_v36 = vmul.f32 1.442695, %v402_v33 }
 0x273   :  { %v474_v34 = vsel %vm338_vm3, %v1404_v31, 0.0  ;;  %v1412_v39 = vpop.eup %1051 }
 0x274   :  { %1053 = vpow2.f32 %v431_v32  ;;  %v447_v40 = vsel %vm338_vm3, %v1412_v39, 0.0 }
 0x275   :  { %475 = vadd.xlane.f32.xlu1 %v474_v34  ;;  %445 = vadd.xlane.f32.xlu0 %v444_v35  ;;  %1055 = vpow2.f32 %v425_v22 }
 0x276   :  { %1057 = vpow2.f32 %v433_v36 }
 0x277   :  { %v356_v38 = vpop.xlane.xlu0 %355 }
 0x278   :  { %v392_v23 = vsub.f32 %v1349_v37, %v356_v38 }
 0x27a   :  { %v1414_v10 = vpop.eup %1053  ;;  %v413_v45 = vmul.f32 1.442695, %v392_v23 }
 0x27b   :  { %v477_v41 = vsel %vm338_vm3, %v1414_v10, 0.0  ;;  %v1421_v48 = vpop.eup %1055 }
 0x27c   :  { %v1423_v1 = vpop.eup %1057  ;;  %1059 = vpow2.f32 %v413_v45  ;;  %v468_v37 = vsel %vm338_vm3, %v1421_v48, 0.0 }
 0x27d   :  { %448 = vadd.xlane.f32.xlu1 %v447_v40  ;;  %478 = vadd.xlane.f32.xlu0 %v477_v41  ;;  %v480_v0 = vsel %vm338_vm3, %v1423_v1, 0.0 }
 0x282   :  { %v1429_v50 = vpop.eup %1059 }
 0x283   :  { %v450_v13 = vsel %vm338_vm3, %v1429_v50, 0.0 }
 0x285   :  { %481 = vadd.xlane.f32.xlu1 %v480_v0  ;;  %469 = vadd.xlane.f32.xlu0 %v468_v37 }
 0x28d   :  { %451 = vadd.xlane.f32.xlu0 %v450_v13 }
 0x2bf   :  { %v437_v51 = vpop.xlane.xlu0 %436 }
 0x2c0   :  { %v455_v14 = vpop.xlane.xlu1 %454  ;;  %1061 = vrcp.f32 %v437_v51 }
 0x2c1   :  { %1063 = vrcp.f32 %v455_v14 }
 0x2c6   :  { %v1062_v53 = vpop.eup %1061 }
 0x2c7   :  { %v1064_v55 = vpop.eup %1063  ;;  %v440_v56 = vpop.xlane.xlu0 %439  ;;  %v499_v59 = vmul.f32 %v1062_v53, %v1357_v44 }
 0x2c8   :  { %v458_v60 = vpop.xlane.xlu1 %457  ;;  %1065 = vrcp.f32 %v440_v56  ;;  %v505_v61 = vmul.f32 %v1064_v55, %v1359_v49 }
 0x2c9   :  { %1067 = vrcp.f32 %v458_v60  ;;  %980 = vmatmul.msk.f32.vlgmr.msra.gmra.mxu1 %vm338_vm3, %v499_v59 }
 0x2ca   :  { %986 = vmatmul.msk.f32.vlgmr.msra.gmra.mxu2 %vm338_vm3, %v505_v61 }
 0x2ce   :  { %v1066_v62 = vpop.eup %1065 }
 0x2cf   :  { %v1068_v27 = vpop.eup %1067  ;;  %v500_v2 = vmul.f32 %v1066_v62, %v1366_v52 }
 0x2d0   :  { %v443_v8 = vpop.xlane.xlu1 %442  ;;  %v506_v3 = vmul.f32 %v1068_v27, %v1368_v54 }
 0x2d1   :  { %1069 = vrcp.f32 %v443_v8  ;;  %981 = vmatmul.msk.f32.gmra.mxu1 %vm338_vm3, %v500_v2 }
 0x2d2   :  { %987 = vmatmul.msk.f32.gmra.mxu2 %vm338_vm3, %v506_v3 }
 0x2d7   :  { %v1070_v44 = vpop.eup %1069  ;;  %v464_v49 = vpop.xlane.xlu0 %463 }
 0x2d8   :  { %v461_v4 = vpop.xlane.xlu1 %460  ;;  %v501_v5 = vmul.f32 %v1070_v44, %v1376_v63 }
 0x2d9   :  { %1071 = vrcp.f32 %v461_v4 }
 0x2da   :  { %982 = vmatmul.msk.f32.gmra.mxu1 %vm338_vm3, %v501_v5  ;;  %1073 = vrcp.f32 %v464_v49 }
 0x2df   :  { %v1072_v6 = vpop.eup %1071 }
 0x2e0   :  { %v467_v9 = vpop.xlane.xlu1 %466  ;;  %v473_v52 = vpop.xlane.xlu0 %472  ;;  %v507_v12 = vmul.f32 %v1072_v6, %v1382_v7 }
 0x2e1   :  { %1075 = vrcp.f32 %v473_v52  ;;  %v1074_v54 = vpop.eup %1073 }
 0x2e2   :  { %988 = vmatmul.msk.f32.gmra.mxu2 %vm338_vm3, %v507_v12  ;;  %1077 = vrcp.f32 %v467_v9  ;;  %v508_v58 = vmul.f32 %v1074_v54, %v1384_v43 }
 0x2e7   :  { %v1076_v15 = vpop.eup %1075 }
 0x2e8   :  { %v476_v16 = vpop.xlane.xlu1 %475  ;;  %v446_v17 = vpop.xlane.xlu0 %445  ;;  %v511_v63 = vmul.f32 %v1076_v15, %v1394_v21 }
 0x2e9   :  { %1079 = vrcp.f32 %v476_v16  ;;  %v1078_v57 = vpop.eup %1077 }
 0x2ea   :  { %1081 = vrcp.f32 %v446_v17  ;;  %989 = vmatmul.msk.f32.gmra.mxu2 %vm338_vm3, %v508_v58  ;;  %992 = vmatmul.msk.f32.vlgmr.msra.gmra.mxu3 %vm338_vm3, %v511_v63  ;;  %v509_v28 = vmul.f32 %v1078_v57, %v1392_v19 }
 0x2ef   :  { %v1080_v7 = vpop.eup %1079 }
 0x2f0   :  { %v1082_v18 = vpop.eup %1081  ;;  %v449_v47 = vpop.xlane.xlu1 %448  ;;  %v512_v24 = vmul.f32 %v1080_v7, %v1404_v31 }
 0x2f1   :  { %v479_v20 = vpop.xlane.xlu0 %478  ;;  %1083 = vrcp.f32 %v449_v47  ;;  %v502_v43 = vmul.f32 %v1082_v18, %v1402_v46 }
 0x2f2   :  { %1085 = vrcp.f32 %v479_v20  ;;  %990 = vmatmul.msk.f32.gmra.mxu2 %vm338_vm3, %v509_v28  ;;  %993 = vmatmul.msk.f32.gmra.mxu3 %vm338_vm3, %v512_v24 }
 0x2f3   :  { %983 = vmatmul.msk.f32.gmra.mxu1 %vm338_vm3, %v502_v43 }
 0x2f7   :  { %v1084_v21 = vpop.eup %1083 }
 0x2f8   :  { %v1086_v25 = vpop.eup %1085  ;;  %v482_v26 = vpop.xlane.xlu1 %481  ;;  %v503_v11 = vmul.f32 %v1084_v21, %v1412_v39  ;;  %v1468_v39 = vld [vmem:[%s1652_s3] sm:$0x1f]  ;;  %s1131_s3 = smov 96  }
 0x2f9   :  { %v470_v29 = vpop.xlane.xlu0 %469  ;;  %1087 = vrcp.f32 %v482_v26  ;;  %v513_v19 = vmul.f32 %v1086_v25, %v1414_v10  ;;  %v628_v10 = vperm.slane %v1468_v39, 3  ;;  %v645_v23 = vperm.slane %v1468_v39, 4 }
 0x2fa   :  { %1089 = vrcp.f32 %v470_v29 }
 0x2fb   :  { %984 = vmatmul.msk.f32.gmra.mxu1 %vm338_vm3, %v503_v11  ;;  %994 = vmatmul.msk.f32.gmra.mxu3 %vm338_vm3, %v513_v19 }
 0x2ff   :  { %v1088_v30 = vpop.eup %1087 }
 0x300   :  { %v1090_v46 = vpop.eup %1089  ;;  %v514_v42 = vmul.f32 %v1088_v30, %v1423_v1 }
 0x301   :  { %v452_v31 = vpop.xlane.xlu0 %451  ;;  %v510_v32 = vmul.f32 %v1090_v46, %v1421_v48  ;;  %v662_v48 = vperm.slane %v1468_v39, 0 }
 0x302   :  { %1091 = vrcp.f32 %v452_v31 }
 0x303   :  { %991 = vmatmul.msk.f32.gmra.mxu2 %vm338_vm3, %v510_v32  ;;  %995 = vmatmul.msk.f32.gmra.mxu3 %vm338_vm3, %v514_v42  ;;  %v1130_v42 = vmov 64.0  }
 0x304   :  { %1093 = vrcp.f32 %v1130_v42 }
 0x308   :  { %v1092_v33 = vpop.eup %1091 }
 0x309   :  { %v504_v34 = vmul.f32 %v1092_v33, %v1429_v50 }
 0x30a   :  { %v1094_v32 = vpop.eup %1093 }
 0x30b   :  { %985 = vmatmul.msk.f32.gmra.mxu1 %vm338_vm3, %v504_v34  ;;  %v696_v33 = vmul.f32 64.0, %v1094_v32  ;;  %vm700_vm4 = vweird.f32 %v1094_v32 }
 0x30d   :  { %v697_v34 = vsub.f32 1.0, %v696_v33 }
 0x346   :  { %v580_v22 = vpop.f32.mrf.mxu1 }
 0x347   :  { %v629_v41 = vmul.f32 %v628_v10, %v580_v22 }
 0x34d   :  { %v598_v35 = vpop.f32.mrf.mxu2 }
 0x34e   :  { %v583_v38 = vpop.f32.mrf.mxu1  ;;  %v635_v43 = vmul.f32 %v628_v10, %v598_v35  ;;  %v698_v35 = vmul.f32 %v1094_v32, %v697_v34  ;;  %v1544_v34 = vperm.slane %v1468_v39, 1 }
 0x34f   :  { %v630_v51 = vmul.f32 %v628_v10, %v583_v38 }
 0x350   :  { %v699_v22 = vadd.f32 %v1094_v32, %v698_v35 }
 0x355   :  { %v601_v36 = vpop.f32.mrf.mxu2 }
 0x356   :  { %v636_v16 = vmul.f32 %v628_v10, %v601_v36  ;;  %v1487_v36 = vsel %vm700_vm4, %v1094_v32, %v699_v22 }
 0x357   :  { %v586_v1 = vpop.f32.mrf.mxu1 }
 0x358   :  { %v631_v62 = vmul.f32 %v628_v10, %v586_v1 }
 0x365   :  { %v604_v40 = vpop.f32.mrf.mxu2 }
 0x366   :  { %v646_v45 = vmul.f32 %v645_v23, %v604_v40 }
 0x368   :  { %v654_v0 = vadd.f32 %v646_v45, %v629_v41 }
 0x36a   :  { %v1473_v37 = vadd.f32 %v662_v48, %v654_v0 }
 0x36c   :  { %v671_v50 = vsel %vm338_vm3, %v1473_v37, 0.0 }
 0x36d   :  { %v607_v13 = vpop.f32.mrf.mxu2  ;;  %672 = vadd.xlane.f32.xlu1 %v671_v50  ;;  %v616_v53 = vpop.f32.mrf.mxu3 }
 0x36e   :  { %v647_v14 = vmul.f32 %v645_v23, %v607_v13  ;;  %v650_v44 = vmul.f32 %v645_v23, %v616_v53 }
 0x370   :  { %v655_v55 = vadd.f32 %v647_v14, %v630_v51  ;;  %v589_v56 = vpop.f32.mrf.mxu1 }
 0x371   :  { %v632_v17 = vmul.f32 %v628_v10, %v589_v56 }
 0x372   :  { %v1477_v59 = vadd.f32 %v662_v48, %v655_v55 }
 0x374   :  { %v674_v60 = vsel %vm338_vm3, %v1477_v59, 0.0 }
 0x375   :  { %v610_v61 = vpop.f32.mrf.mxu2  ;;  %675 = vadd.xlane.f32.xlu2 %v674_v60  ;;  %v619_v2 = vpop.f32.mrf.mxu3 }
 0x376   :  { %v648_v27 = vmul.f32 %v645_v23, %v610_v61  ;;  %v651_v7 = vmul.f32 %v645_v23, %v619_v2 }
 0x378   :  { %v656_v8 = vadd.f32 %v648_v27, %v631_v62  ;;  %v592_v3 = vpop.f32.mrf.mxu1 }
 0x379   :  { %v633_v4 = vmul.f32 %v628_v10, %v592_v3 }
 0x37a   :  { %v665_v49 = vadd.f32 %v662_v48, %v656_v8 }
 0x37b   :  { %v658_v5 = vadd.f32 %v650_v44, %v633_v4 }
 0x37c   :  { %v677_v6 = vsel %vm338_vm3, %v665_v49, 0.0 }
 0x37d   :  { %678 = vadd.xlane.f32.xlu0 %v677_v6  ;;  %v667_v9 = vadd.f32 %v662_v48, %v658_v5 }
 0x37e   :  { %v622_v52 = vpop.f32.mrf.mxu3 }
 0x37f   :  { %v683_v12 = vsel %vm338_vm3, %v667_v9, 0.0  ;;  %v652_v47 = vmul.f32 %v645_v23, %v622_v52 }
 0x380   :  { %684 = vadd.xlane.f32.xlu2 %v683_v12 }
 0x381   :  { %v660_v29 = vadd.f32 %v652_v47, %v635_v43 }
 0x383   :  { %v669_v46 = vadd.f32 %v662_v48, %v660_v29 }
 0x385   :  { %v689_v31 = vsel %vm338_vm3, %v669_v46, 0.0 }
 0x386   :  { %v613_v54 = vpop.f32.mrf.mxu2  ;;  %v625_v15 = vpop.f32.mrf.mxu3 }
 0x387   :  { %v649_v58 = vmul.f32 %v645_v23, %v613_v54  ;;  %v653_v63 = vmul.f32 %v645_v23, %v625_v15 }
 0x388   :  { %v595_v57 = vpop.f32.mrf.mxu1 }
 0x389   :  { %v634_v18 = vmul.f32 %v628_v10, %v595_v57  ;;  %v657_v20 = vadd.f32 %v649_v58, %v632_v17  ;;  %v661_v28 = vadd.f32 %v653_v63, %v636_v16 }
 0x38b   :  { %v659_v24 = vadd.f32 %v651_v7, %v634_v18  ;;  %v666_v21 = vadd.f32 %v662_v48, %v657_v20  ;;  %v670_v25 = vadd.f32 %v662_v48, %v661_v28 }
 0x38d   :  { %v668_v26 = vadd.f32 %v662_v48, %v659_v24  ;;  %v680_v11 = vsel %vm338_vm3, %v666_v21, 0.0  ;;  %v692_v19 = vsel %vm338_vm3, %v670_v25, 0.0 }
 0x38e   :  { %681 = vadd.xlane.f32.xlu1 %v680_v11  ;;  %693 = vadd.xlane.f32.xlu2 %v692_v19 }
 0x38f   :  { %v686_v30 = vsel %vm338_vm3, %v668_v26, 0.0 }
 0x390   :  { %687 = vadd.xlane.f32.xlu0 %v686_v30 }
 0x396   :  { %690 = vadd.xlane.f32.xlu1 %v689_v31 }
 0x3e0   :  { %v673_v38 = vpop.xlane.xlu1 %672 }
 0x3e1   :  { %v702_v10 = vmul.f32 %v1487_v36, %v673_v38 }
 0x3e3   :  { %v1491_v23 = vsub.f32 %v1473_v37, %v702_v10 }
 0x3e5   :  { %v718_v40 = vmul.f32 %v1491_v23, %v1491_v23 }
 0x3e7   :  { %v726_v41 = vsel %vm338_vm3, %v718_v40, 0.0  ;;  %v1548_v40 = vperm.slane %v1468_v39, 2 }
 0x3e8   :  { %v676_v45 = vpop.xlane.xlu2 %675  ;;  %727 = vadd.xlane.f32.xlu0 %v726_v41 }
 0x3e9   :  { %v703_v48 = vmul.f32 %v1487_v36, %v676_v45 }
 0x3eb   :  { %v1498_v1 = vsub.f32 %v1477_v59, %v703_v48 }
 0x3ed   :  { %v719_v0 = vmul.f32 %v1498_v1, %v1498_v1 }
 0x3ef   :  { %v729_v50 = vsel %vm338_vm3, %v719_v0, 0.0 }
 0x3f0   :  { %v679_v13 = vpop.xlane.xlu0 %678  ;;  %730 = vadd.xlane.f32.xlu1 %v729_v50 }
 0x3f1   :  { %v704_v37 = vmul.f32 %v1487_v36, %v679_v13 }
 0x3f3   :  { %v1504_v51 = vsub.f32 %v665_v49, %v704_v37  ;;  %v685_v14 = vpop.xlane.xlu2 %684 }
 0x3f4   :  { %v706_v53 = vmul.f32 %v1487_v36, %v685_v14 }
 0x3f5   :  { %v720_v55 = vmul.f32 %v1504_v51, %v1504_v51 }
 0x3f6   :  { %v1509_v56 = vsub.f32 %v667_v9, %v706_v53 }
 0x3f7   :  { %v732_v59 = vsel %vm338_vm3, %v720_v55, 0.0 }
 0x3f8   :  { %733 = vadd.xlane.f32.xlu2 %v732_v59  ;;  %v722_v60 = vmul.f32 %v1509_v56, %v1509_v56 }
 0x3fa   :  { %v738_v61 = vsel %vm338_vm3, %v722_v60, 0.0 }
 0x3fb   :  { %739 = vadd.xlane.f32.xlu1 %v738_v61 }
 0x401   :  { %v682_v62 = vpop.xlane.xlu1 %681  ;;  %v694_v27 = vpop.xlane.xlu2 %693 }
 0x402   :  { %v705_v2 = vmul.f32 %v1487_v36, %v682_v62  ;;  %v709_v8 = vmul.f32 %v1487_v36, %v694_v27 }
 0x403   :  { %v688_v3 = vpop.xlane.xlu0 %687 }
 0x404   :  { %v707_v44 = vmul.f32 %v1487_v36, %v688_v3  ;;  %v1518_v4 = vsub.f32 %v666_v21, %v705_v2  ;;  %v1520_v49 = vsub.f32 %v670_v25, %v709_v8 }
 0x406   :  { %v1522_v5 = vsub.f32 %v668_v26, %v707_v44  ;;  %v725_v6 = vmul.f32 %v1520_v49, %v1520_v49  ;;  %v721_v9 = vmul.f32 %v1518_v4, %v1518_v4 }
 0x408   :  { %v723_v52 = vmul.f32 %v1522_v5, %v1522_v5  ;;  %v747_v12 = vsel %vm338_vm3, %v725_v6, 0.0  ;;  %v735_v54 = vsel %vm338_vm3, %v721_v9, 0.0 }
 0x409   :  { %v691_v15 = vpop.xlane.xlu1 %690  ;;  %748 = vadd.xlane.f32.xlu1 %v747_v12  ;;  %736 = vadd.xlane.f32.xlu0 %v735_v54 }
 0x40a   :  { %v741_v16 = vsel %vm338_vm3, %v723_v52, 0.0  ;;  %v708_v17 = vmul.f32 %v1487_v36, %v691_v15 }
 0x40b   :  { %742 = vadd.xlane.f32.xlu2 %v741_v16 }
 0x40c   :  { %v1534_v58 = vsub.f32 %v669_v46, %v708_v17 }
 0x40e   :  { %v724_v63 = vmul.f32 %v1534_v58, %v1534_v58 }
 0x410   :  { %v744_v57 = vsel %vm338_vm3, %v724_v63, 0.0 }
 0x411   :  { %745 = vadd.xlane.f32.xlu0 %v744_v57 }
 0x45b   :  { %v728_v7 = vpop.xlane.xlu0 %727 }
 0x45c   :  { %v750_v18 = vmul.f32 %v728_v7, %v1487_v36 }
 0x45e   :  { %v758_v47 = vadd.f32 1e-05, %v750_v18 }
 0x460   :  { %1095 = vrsqrt.f32 %v758_v47  ;;  %vm772_vm5 = vweird.f32 %v758_v47 }
 0x463   :  { %v731_v20 = vpop.xlane.xlu1 %730 }
 0x464   :  { %v751_v28 = vmul.f32 %v731_v20, %v1487_v36 }
 0x466   :  { %v1096_v24 = vpop.eup %1095  ;;  %v759_v43 = vadd.f32 1e-05, %v751_v28 }
 0x467   :  { %v767_v21 = vmul.f32 %v1096_v24, %v758_v47  ;;  %vm773_vm3 = vweird.f32 %v1096_v24 }
 0x468   :  { %1097 = vrsqrt.f32 %v759_v43  ;;  %vm774_vm6 = vmor %vm772_vm5, %vm773_vm3  ;;  %vm782_vm8 = vweird.f32 %v759_v43 }
 0x469   :  { %v768_v25 = vmul.f32 %v1096_v24, %v767_v21 }
 0x46b   :  { %v769_v26 = vmul.f32 0.5, %v768_v25  ;;  %v734_v29 = vpop.xlane.xlu2 %733 }
 0x46c   :  { %v752_v11 = vmul.f32 %v734_v29, %v1487_v36 }
 0x46d   :  { %v770_v19 = vsub.f32 1.5, %v769_v26 }
 0x46e   :  { %v1098_v30 = vpop.eup %1097  ;;  %v760_v46 = vadd.f32 1e-05, %v752_v11  ;;  %v740_v31 = vpop.xlane.xlu1 %739 }
 0x46f   :  { %v771_v42 = vmul.f32 %v1096_v24, %v770_v19  ;;  %v777_v32 = vmul.f32 %v1098_v30, %v759_v43  ;;  %v754_v33 = vmul.f32 %v740_v31, %v1487_v36  ;;  %vm783_vm7 = vweird.f32 %v1098_v30 }
 0x470   :  { %1099 = vrsqrt.f32 %v760_v46  ;;  %vm784_vm9 = vmor %vm782_vm8, %vm783_vm7  ;;  %vm792_vm11 = vweird.f32 %v760_v46 }
 0x471   :  { %v775_v35 = vsel %vm774_vm6, %v1096_v24, %v771_v42  ;;  %v778_v22 = vmul.f32 %v1098_v30, %v777_v32  ;;  %v762_v38 = vadd.f32 1e-05, %v754_v33 }
 0x472   :  { %v846_v10 = vmul.f32 %v775_v35, %v1491_v23 }
 0x473   :  { %v779_v41 = vmul.f32 0.5, %v778_v22  ;;  %1101 = vrsqrt.f32 %v762_v38  ;;  %vm812_vm14 = vweird.f32 %v762_v38 }
 0x474   :  { %v855_v45 = vmul.f32 %v1544_v34, %v846_v10 }
 0x475   :  { %v780_v48 = vsub.f32 1.5, %v779_v41 }
 0x476   :  { %v1100_v0 = vpop.eup %1099  ;;  %v864_v50 = vadd.f32 %v1548_v40, %v855_v45 }
 0x477   :  { %v781_v13 = vmul.f32 %v1098_v30, %v780_v48  ;;  %v787_v37 = vmul.f32 %v1100_v0, %v760_v46  ;;  %vm793_vm10 = vweird.f32 %v1100_v0 }
 0x478   :  { %v880_v14 = vmul.f32 1.442695, %v864_v50  ;;  %vm794_vm12 = vmor %vm792_vm11, %vm793_vm10  ;;  %vm872_vm1 = vcmp.gt.f32.partialorder %v864_v50, 0.0 }
 0x479   :  { %v1102_v53 = vpop.eup %1101  ;;  %v785_v55 = vsel %vm784_vm9, %v1098_v30, %v781_v13  ;;  %v788_v23 = vmul.f32 %v1100_v0, %v787_v37 }
 0x47a   :  { %v847_v39 = vmul.f32 %v785_v55, %v1498_v1  ;;  %v807_v59 = vmul.f32 %v1102_v53, %v762_v38  ;;  %1103 = vpow2.f32 %v880_v14  ;;  %vm813_vm13 = vweird.f32 %v1102_v53 }
 0x47b   :  { %v789_v60 = vmul.f32 0.5, %v788_v23  ;;  %vm814_vm15 = vmor %vm812_vm14, %vm813_vm13 }
 0x47c   :  { %v808_v61 = vmul.f32 %v1102_v53, %v807_v59  ;;  %v749_v62 = vpop.xlane.xlu1 %748  ;;  %v737_v27 = vpop.xlane.xlu0 %736  ;;  %v856_v2 = vmul.f32 %v1544_v34, %v847_v39 }
 0x47d   :  { %v790_v8 = vsub.f32 1.5, %v789_v60  ;;  %v757_v3 = vmul.f32 %v749_v62, %v1487_v36  ;;  %v753_v44 = vmul.f32 %v737_v27, %v1487_v36 }
 0x47e   :  { %v743_v6 = vpop.xlane.xlu2 %742  ;;  %v809_v9 = vmul.f32 0.5, %v808_v61  ;;  %v865_v1 = vadd.f32 %v1548_v40, %v856_v2 }
 0x47f   :  { %v755_v52 = vmul.f32 %v743_v6, %v1487_v36  ;;  %v791_v12 = vmul.f32 %v1100_v0, %v790_v8  ;;  %v1558_v54 = vadd.f32 1e-05, %v757_v3  ;;  %v1560_v15 = vadd.f32 1e-05, %v753_v44 }
 0x480   :  { %v1104_v16 = vpop.eup %1103  ;;  %v810_v17 = vsub.f32 1.5, %v809_v9  ;;  %v882_v57 = vmul.f32 1.442695, %v865_v1  ;;  %vm873_vm2 = vcmp.gt.f32.partialorder %v865_v1, 0.0 }
 0x481   :  { %v1562_v63 = vadd.f32 1e-05, %v755_v52  ;;  %v795_v7 = vsel %vm794_vm12, %v1100_v0, %v791_v12  ;;  %1105 = vrsqrt.f32 %v1558_v54  ;;  %v996_v20 = vadd.f32 -1.0, %v1104_v16 }
 0x482   :  { %v848_v18 = vmul.f32 %v795_v7, %v1504_v51  ;;  %v811_v47 = vmul.f32 %v1102_v53, %v810_v17  ;;  %1107 = vrsqrt.f32 %v1560_v15  ;;  %vm842_vm3 = vweird.f32 %v1558_v54 }
 0x483   :  { %1109 = vrsqrt.f32 %v1562_v63  ;;  %v1571_v26 = vsel %vm872_vm1, %v864_v50, %v996_v20  ;;  %vm802_vm8 = vweird.f32 %v1560_v15  ;;  %vm822_vm9 = vweird.f32 %v1562_v63 }
 0x484   :  { %v815_v28 = vsel %vm814_vm15, %v1102_v53, %v811_v47  ;;  %v746_v24 = vpop.xlane.xlu0 %745  ;;  %1111 = vpow2.f32 %v882_v57  ;;  %v857_v43 = vmul.f32 %v1544_v34, %v848_v18  ;;  %920 = vrot.lane.b32.xlu2 %v1571_v26, %s1131_s3 }
 0x485   :  { %v850_v21 = vmul.f32 %v815_v28, %v1509_v56  ;;  %v756_v25 = vmul.f32 %v746_v24, %v1487_v36 }
 0x486   :  { %v866_v51 = vadd.f32 %v1548_v40, %v857_v43 }
 0x487   :  { %v1106_v29 = vpop.eup %1105  ;;  %v1576_v11 = vadd.f32 1e-05, %v756_v25  ;;  %v859_v19 = vmul.f32 %v1544_v34, %v850_v21 }
 0x488   :  { %v1108_v30 = vpop.eup %1107  ;;  %v837_v46 = vmul.f32 %v1106_v29, %v1558_v54  ;;  %v884_v31 = vmul.f32 1.442695, %v866_v51  ;;  %vm843_vm4 = vweird.f32 %v1106_v29  ;;  %vm874_vm11 = vcmp.gt.f32.partialorder %v866_v51, 0.0 }
 0x489   :  { %v1110_v56 = vpop.eup %1109  ;;  %v797_v36 = vmul.f32 %v1108_v30, %v1560_v15  ;;  %1113 = vrsqrt.f32 %v1576_v11  ;;  %v868_v38 = vadd.f32 %v1548_v40, %v859_v19  ;;  %vm803_vm5 = vweird.f32 %v1108_v30  ;;  %vm844_vm7 = vmor %vm842_vm3, %vm843_vm4 }
 0x48a   :  { %v1112_v42 = vpop.eup %1111  ;;  %v838_v32 = vmul.f32 %v1106_v29, %v837_v46  ;;  %v817_v33 = vmul.f32 %v1110_v56, %v1562_v63  ;;  %1115 = vpow2.f32 %v884_v31  ;;  %vm823_vm6 = vweird.f32 %v1110_v56  ;;  %vm804_vm10 = vmor %vm802_vm8, %vm803_vm5 }
 0x48b   :  { %v798_v35 = vmul.f32 %v1108_v30, %v797_v36  ;;  %v997_v22 = vadd.f32 -1.0, %v1112_v42  ;;  %v888_v0 = vmul.f32 1.442695, %v868_v38  ;;  %vm824_vm12 = vmor %vm822_vm9, %vm823_vm6  ;;  %vm876_vm14 = vcmp.gt.f32.partialorder %v868_v38, 0.0 }
 0x48c   :  { %v839_v10 = vmul.f32 0.5, %v838_v32  ;;  %v818_v41 = vmul.f32 %v1110_v56, %v817_v33  ;;  %vm832_vm15 = vweird.f32 %v1576_v11 }
 0x48d   :  { %v799_v45 = vmul.f32 0.5, %v798_v35  ;;  %v1584_v48 = vsel %vm873_vm2, %v865_v1, %v997_v22  ;;  %1117 = vpow2.f32 %v888_v0 }
 0x48e   :  { %v840_v50 = vsub.f32 1.5, %v839_v10  ;;  %v819_v13 = vmul.f32 0.5, %v818_v41  ;;  %922 = vrot.lane.b32.xlu0 %v1584_v48, %s1131_s3 }
 0x48f   :  { %v1114_v37 = vpop.eup %1113  ;;  %v800_v14 = vsub.f32 1.5, %v799_v45 }
 0x490   :  { %v1116_v53 = vpop.eup %1115  ;;  %v841_v55 = vmul.f32 %v1106_v29, %v840_v50  ;;  %v820_v23 = vsub.f32 1.5, %v819_v13  ;;  %v827_v39 = vmul.f32 %v1114_v37, %v1576_v11  ;;  %vm833_vm13 = vweird.f32 %v1114_v37 }
 0x491   :  { %v801_v59 = vmul.f32 %v1108_v30, %v800_v14  ;;  %v998_v60 = vadd.f32 -1.0, %v1116_v53  ;;  %vm834_vm1 = vmor %vm832_vm15, %vm833_vm13 }
 0x492   :  { %v845_v61 = vsel %vm844_vm7, %v1106_v29, %v841_v55  ;;  %v821_v62 = vmul.f32 %v1110_v56, %v820_v23  ;;  %v828_v27 = vmul.f32 %v1114_v37, %v827_v39 }
 0x493   :  { %v853_v2 = vmul.f32 %v845_v61, %v1520_v49  ;;  %v805_v8 = vsel %vm804_vm10, %v1108_v30, %v801_v59  ;;  %v1593_v3 = vsel %vm874_vm11, %v866_v51, %v998_v60  ;;  %v1118_v52 = vpop.eup %1117 }
 0x494   :  { %v849_v44 = vmul.f32 %v805_v8, %v1518_v4  ;;  %v825_v6 = vsel %vm824_vm12, %v1110_v56, %v821_v62  ;;  %v829_v9 = vmul.f32 0.5, %v828_v27  ;;  %924 = vrot.lane.b32.xlu1 %v1593_v3, %s1131_s3  ;;  %v1000_v15 = vadd.f32 -1.0, %v1118_v52 }
 0x495   :  { %v851_v1 = vmul.f32 %v825_v6, %v1522_v5  ;;  %v862_v12 = vmul.f32 %v1544_v34, %v853_v2 }
 0x496   :  { %v830_v54 = vsub.f32 1.5, %v829_v9  ;;  %v858_v49 = vmul.f32 %v1544_v34, %v849_v44  ;;  %v908_v63 = vsel %vm876_vm14, %v868_v38, %v1000_v15 }
 0x497   :  { %v871_v16 = vadd.f32 %v1548_v40, %v862_v12  ;;  %v860_v4 = vmul.f32 %v1544_v34, %v851_v1  ;;  %928 = vrot.lane.b32.xlu2 %v908_v63, %s1131_s3 }
 0x498   :  { %v831_v17 = vmul.f32 %v1114_v37, %v830_v54  ;;  %v867_v57 = vadd.f32 %v1548_v40, %v858_v49 }
 0x499   :  { %v894_v5 = vmul.f32 1.442695, %v871_v16  ;;  %v869_v7 = vadd.f32 %v1548_v40, %v860_v4  ;;  %vm879_vm2 = vcmp.gt.f32.partialorder %v871_v16, 0.0 }
 0x49a   :  { %v835_v18 = vsel %vm834_vm1, %v1114_v37, %v831_v17  ;;  %v886_v47 = vmul.f32 1.442695, %v867_v57  ;;  %vm875_vm4 = vcmp.gt.f32.partialorder %v867_v57, 0.0 }
 0x49b   :  { %v852_v20 = vmul.f32 %v835_v18, %v1534_v58  ;;  %1119 = vpow2.f32 %v894_v5  ;;  %v890_v28 = vmul.f32 1.442695, %v869_v7  ;;  %vm877_vm3 = vcmp.gt.f32.partialorder %v869_v7, 0.0 }
 0x49c   :  { %1121 = vpow2.f32 %v886_v47 }
 0x49d   :  { %1123 = vpow2.f32 %v890_v28  ;;  %v861_v24 = vmul.f32 %v1544_v34, %v852_v20 }
 0x49f   :  { %v870_v43 = vadd.f32 %v1548_v40, %v861_v24 }
 0x4a1   :  { %v1120_v21 = vpop.eup %1119  ;;  %v892_v25 = vmul.f32 1.442695, %v870_v43  ;;  %vm878_vm5 = vcmp.gt.f32.partialorder %v870_v43, 0.0 }
 0x4a2   :  { %v1122_v51 = vpop.eup %1121  ;;  %v1003_v29 = vadd.f32 -1.0, %v1120_v21 }
 0x4a3   :  { %v1124_v11 = vpop.eup %1123  ;;  %v999_v19 = vadd.f32 -1.0, %v1122_v51  ;;  %1125 = vpow2.f32 %v892_v25 }
 0x4a4   :  { %v911_v30 = vsel %vm879_vm2, %v871_v16, %v1003_v29  ;;  %v1001_v46 = vadd.f32 -1.0, %v1124_v11 }
 0x4a5   :  { %934 = vrot.lane.b32.xlu2 %v911_v30, %s1131_s3  ;;  %v907_v58 = vsel %vm875_vm4, %v867_v57, %v999_v19 }
 0x4a6   :  { %926 = vrot.lane.b32.xlu0 %v907_v58, %s1131_s3  ;;  %v909_v34 = vsel %vm877_vm3, %v869_v7, %v1001_v46 }
 0x4a7   :  { %930 = vrot.lane.b32.xlu1 %v909_v34, %s1131_s3 }
 0x4a9   :  { %v1126_v40 = vpop.eup %1125 }
 0x4aa   :  { %v1002_v31 = vadd.f32 -1.0, %v1126_v40 }
 0x4ac   :  { %v910_v56 = vsel %vm878_vm5, %v870_v43, %v1002_v31 }
 0x4ae   :  { %932 = vrot.lane.b32.xlu0 %v910_v56, %s1131_s3 }
 0x4de   :  { %v921_v36 = vpop.permute.xlu2 %920 }
 0x4df   :  { %v944_v42 = vadd.f32 %v921_v36, %v1571_v26 }
 0x4e1   :  { %v952_v32 = vmul.f32 0.5, %v944_v42 }
 0x4e3   :  { %960 = vst.msk [vmem:[%s1653_s4] sm:$0xff] %vm30_vm0, %v952_v32 }
 0x4f1   :  { %v929_v33 = vpop.permute.xlu2 %928 }
 0x4f2   :  { %v948_v35 = vadd.f32 %v929_v33, %v908_v63 }
 0x4f4   :  { %v956_v22 = vmul.f32 0.5, %v948_v35 }
 0x4f6   :  { %964 = vst.msk [vmem:[%s1653_s4 + $0x20] sm:$0xff] %vm30_vm0, %v956_v22 }
 0x4ff   :  { %v935_v38 = vpop.permute.xlu2 %934 }
 0x500   :  { %v951_v10 = vadd.f32 %v935_v38, %v911_v30  ;;  %v923_v41 = vpop.permute.xlu0 %922 }
 0x501   :  { %v945_v45 = vadd.f32 %v923_v41, %v1584_v48 }
 0x502   :  { %v959_v26 = vmul.f32 0.5, %v951_v10 }
 0x503   :  { %v953_v0 = vmul.f32 0.5, %v945_v45 }
 0x504   :  { %967 = vst.msk [vmem:[%s1653_s4 + $0x38] sm:$0xff] %vm30_vm0, %v959_v26 }
 0x505   :  { %961 = vst.msk [vmem:[%s1653_s4 + $0x8] sm:$0xff] %vm30_vm0, %v953_v0 }
 0x506   :  { %v925_v50 = vpop.permute.xlu1 %924 }
 0x507   :  { %v946_v13 = vadd.f32 %v925_v50, %v1593_v3 }
 0x509   :  { %v954_v37 = vmul.f32 0.5, %v946_v13 }
 0x50b   :  { %962 = vst.msk [vmem:[%s1653_s4 + $0x10] sm:$0xff] %vm30_vm0, %v954_v37 }
 0x518   :  { %v927_v48 = vpop.permute.xlu0 %926 }
 0x519   :  { %v947_v14 = vadd.f32 %v927_v48, %v907_v58  ;;  %v931_v53 = vpop.permute.xlu1 %930 }
 0x51a   :  { %v949_v55 = vadd.f32 %v931_v53, %v909_v34 }
 0x51b   :  { %v955_v23 = vmul.f32 0.5, %v947_v14 }
 0x51c   :  { %v957_v39 = vmul.f32 0.5, %v949_v55 }
 0x51d   :  { %963 = vst.msk [vmem:[%s1653_s4 + $0x18] sm:$0xff] %vm30_vm0, %v955_v23 }
 0x51e   :  { %965 = vst.msk [vmem:[%s1653_s4 + $0x28] sm:$0xff] %vm30_vm0, %v957_v39 }
 0x520   :  { %v933_v59 = vpop.permute.xlu0 %932 }
 0x521   :  { %v950_v60 = vadd.f32 %v933_v59, %v910_v56 }
 0x523   :  { %v958_v61 = vmul.f32 0.5, %v950_v60 }
 0x525   :  { %966 = vst.msk [vmem:[%s1653_s4 + $0x30] sm:$0xff] %vm30_vm0, %v958_v61 }

</bundles_post_ra>
